<compile_context>
chip_gen: v7x
topology: tpu7x:2x2x1
jax: 0.10.0
libtpu: 0.0.40
codegen_flags: <defaults>
</compile_context>

<pallas_src>
import functools

import jax
import jax.numpy as jnp
from jax import lax
from jax.experimental import pallas as pl
from jax.experimental.pallas import tpu as pltpu

LANE = 128


# ------------------------------ small helpers ------------------------------


def _rup(n, m=LANE):
    return ((n + m - 1) // m) * m


def _pad_to(a, shape):
    """Zero-pad 2-D array `a` up to `shape`."""
    pads = [(0, s - d) for d, s in zip(a.shape, shape)]
    return jnp.pad(a, pads)


def _sigmoid(x):
    # Single-EUP formulation: sigmoid(x) = 0.5*tanh(x/2) + 0.5.
    return 0.5 * jnp.tanh(0.5 * x) + 0.5


def _silu(x):
    return x * _sigmoid(x)


def _vmem_limit_bytes():
    """Generation-aware scoped-VMEM limit."""
    try:
        cap = int(pltpu.get_tpu_info().vmem_capacity_bytes)
    except Exception:
        return 32 * 1024 * 1024          # unknown chip: conservative default
    if cap <= 64 * 1024 * 1024:
        return 48 * 1024 * 1024          # v7x-class: leave compiler headroom
    return 100 * 1024 * 1024             # v5e/v6e: allow big tiles


_ROLL_SIGN = None


def _roll_convention_sign():
    """+1 if pltpu.roll matches jnp.roll(x, shift) semantics, else -1."""
    global _ROLL_SIGN
    if _ROLL_SIGN is None:
        def probe(x_ref, o_ref):
            o_ref[...] = pltpu.roll(x_ref[...], shift=1, axis=0)

        x = jnp.arange(8 * 128, dtype=jnp.float32).reshape(8, 128)
        got = pl.pallas_call(
            probe, out_shape=jax.ShapeDtypeStruct((8, 128), jnp.float32))(x)
        if bool(jnp.array_equal(got, jnp.roll(x, 1, axis=0))):
            _ROLL_SIGN = 1
        elif bool(jnp.array_equal(got, jnp.roll(x, -1, axis=0))):
            _ROLL_SIGN = -1
        else:
            raise RuntimeError("unexpected pltpu.roll semantics")
    return _ROLL_SIGN


# ----------------------------- Pallas kernel -------------------------------


def mb_block_kernel(adds_ref, x_ref,
                    w1_ref, b1_ref, dw_ref, dwb_ref,
                    sw1_ref, sb1_ref, sw2_ref, sb2_ref,
                    w2_ref, b2_ref,
                    o_ref, carry_ref,
                    *, H, W, ksize, mxu_dt, act_dt, roll_sign):
    """One rep of the MbBlock per grid step; activation carried in VMEM."""
    r = pl.program_id(1)
    HW = H * W
    p = ksize // 2

    # rep 0: load this image's input activation into the on-chip carry.
    @pl.when(r == 0)
    def _():
        carry_ref[...] = x_ref[0].astype(carry_ref.dtype)

    xr = carry_ref[...]                                    # (HW, C_io)

    # ---- 1) expand 1x1 conv (+ folded BN) + SiLU: one MXU matmul ----------
    hf = jnp.dot(xr.astype(mxu_dt), w1_ref[0],
                 preferred_element_type=jnp.float32) + b1_ref[0]
    hf = _silu(hf)                                         # (HW, Cmid) f32

    # ---- 2) depthwise kxk conv, stride 1, SAME (+ folded BN) + SiLU -------
    # Flattened (HW, C) form: each tap = one XLU roll + boolean-mask select
    # + one multiply, accumulated in f32.  Row masks reduce to thresholds on
    # the flat index; column masks use col = idx mod W.
    dw = dw_ref[0]                                         # (k*k, Cmid)
    idx = lax.broadcasted_iota(jnp.int32, (HW, 1), 0)
    if (W & (W - 1)) == 0:                                 # power-of-two fast path
        col = jnp.bitwise_and(idx, W - 1)
    else:
        col = idx % W

    h_roll = hf.astype(act_dt)                             # bf16 on v6e/v7x opt-in
    center = p * ksize + p
    # Accumulator initialized with center tap + bias: saves a zeros pass and
    # a separate bias add.
    acc = (h_roll * dw[center:center + 1, :]).astype(jnp.float32) + dwb_ref[0]

    for di in range(ksize):
        sr = p - di
        for dj in range(ksize):
            sc = p - dj
            if sr == 0 and sc == 0:
                continue
            t = di * ksize + dj
            tap = dw[t:t + 1, :]                           # (1, Cmid)
            shift = (roll_sign * (sr * W + sc)) % HW
            shifted = pltpu.roll(h_roll, shift=shift, axis=0)      # XLU
            conds = []
            if sr > 0:
                conds.append(idx >= sr * W)
            elif sr < 0:
                conds.append(idx < (H + sr) * W)
            if sc > 0:
                conds.append(col >= sc)
            elif sc < 0:
                conds.append(col < W + sc)
            mask = conds[0]
            for c in conds[1:]:
                mask = mask & c
            acc = acc + jnp.where(mask,
                                  (shifted * tap).astype(jnp.float32), 0.0)
    h2 = _silu(acc)                                        # (HW, Cmid) f32

    # ---- 3) squeeze-excite -------------------------------------------------
    s = jnp.mean(h2, axis=0, keepdims=True)                # (1, Cmid)
    s = _silu(jnp.dot(s, sw1_ref[0],
                      preferred_element_type=jnp.float32) + sb1_ref[0])
    s = _sigmoid(jnp.dot(s, sw2_ref[0],
                         preferred_element_type=jnp.float32) + sb2_ref[0])
    h2 = h2 * s

    # ---- 4) project 1x1 conv (+ folded BN), no activation ------------------
    out = jnp.dot(h2.astype(mxu_dt), w2_ref[0],
                  preferred_element_type=jnp.float32) + b2_ref[0]   # (HW, C_io)

    # residual: f.add_(x); f.mul_(0.5)  (per-rep flag from SMEM)
    do_add = adds_ref[r] == 1
    res = jnp.where(do_add, (out + xr.astype(jnp.float32)) * 0.5, out)

    carry_ref[...] = res.astype(carry_ref.dtype)

    @pl.when(r == pl.num_programs(1) - 1)
    def _():
        o_ref[0] = res.astype(o_ref.dtype)


def mb_block_call(x_flat, adds, stacked, *, H, W, ksize, mxu_bf16, act_bf16):
    N, HW, c_io = x_flat.shape
    reps = int(adds.shape[0])
    mxu_dt = jnp.bfloat16 if mxu_bf16 else jnp.float32
    act_dt = jnp.bfloat16 if act_bf16 else jnp.float32
    carry_dt = act_dt

    kern = functools.partial(
        mb_block_kernel, H=H, W=W, ksize=ksize, mxu_dt=mxu_dt, act_dt=act_dt,
        roll_sign=_roll_convention_sign())

    def _wspec(arr):
        # one rep's slice of the stacked weights per grid step
        return pl.BlockSpec((1,) + tuple(arr.shape[1:]),
                            lambda n, r, adds_ref: (r, 0, 0))

    in_specs = [pl.BlockSpec((1, HW, c_io), lambda n, r, adds_ref: (n, 0, 0))]
    in_specs += [_wspec(w) for w in stacked]

    grid_spec = pltpu.PrefetchScalarGridSpec(
        num_scalar_prefetch=1,                 # per-rep residual-add flags
        grid=(N, reps),
        in_specs=in_specs,
        out_specs=pl.BlockSpec((1, HW, c_io), lambda n, r, adds_ref: (n, 0, 0)),
        scratch_shapes=[pltpu.VMEM((HW, c_io), carry_dt)],
    )

    return pl.pallas_call(
        kern,
        out_shape=jax.ShapeDtypeStruct((N, HW, c_io), carry_dt),
        grid_spec=grid_spec,
        compiler_params=pltpu.CompilerParams(
            # batch axis shards across TensorCores; rep axis carries state.
            dimension_semantics=("parallel", "arbitrary"),
            vmem_limit_bytes=_vmem_limit_bytes()),
    )(adds, x_flat, *stacked)


# ------------------------- parameter init + glue ---------------------------


def _bn_fold(key, c):
    k1, k2, k3, k4 = jax.random.split(key, 4)
    gamma = 1.0 + 0.1 * jax.random.normal(k1, (c,), jnp.float32)
    beta = 0.1 * jax.random.normal(k2, (c,), jnp.float32)
    mean = 0.1 * jax.random.normal(k3, (c,), jnp.float32)
    var = 1.0 + 0.1 * jax.random.uniform(k4, (c,), jnp.float32)
    scale = gamma / jnp.sqrt(var + 1e-5)
    bias = beta - mean * scale
    return scale, bias


def init_mbconv(key, cin, cout, ksize, stride, expand_ratio, se_reduction=4):
    assert stride == 1, "kernel implements stride=1 only"
    assert expand_ratio > 1, "expand_ratio==1 (EmptyLayer) path not implemented"
    cmid = cin * expand_ratio
    cse = max(1, cmid // se_reduction)
    ks = jax.random.split(key, 8)

    # expand 1x1 conv (OIHW (cmid,cin,1,1)) + BN folded
    w_e = 0.1 * jax.random.normal(ks[0], (cmid, cin), jnp.float32)
    s_e, b_e = _bn_fold(ks[1], cmid)
    w1 = (w_e * s_e[:, None]).T                        # (cin, cmid)
    b1 = b_e[None, :]                                  # (1, cmid)

    # depthwise conv (OIHW (cmid,1,k,k)) + BN folded
    w_d = 0.1 * jax.random.normal(ks[2], (cmid, ksize, ksize), jnp.float32)
    s_d, b_d = _bn_fold(ks[3], cmid)
    w_d = w_d * s_d[:, None, None]
    dw = jnp.transpose(w_d, (1, 2, 0)).reshape(ksize * ksize, cmid)
    dwb = b_d[None, :]

    # squeeze-excite linears
    fc1_w = 0.1 * jax.random.normal(ks[4], (cse, cmid), jnp.float32)
    fc1_b = 0.1 * jax.random.normal(ks[5], (cse,), jnp.float32)
    fc2_w = 0.1 * jax.random.normal(ks[6], (cmid, cse), jnp.float32)
    fc2_b = 0.1 * jax.random.normal(ks[7], (cmid,), jnp.float32)

    # project 1x1 conv (OIHW (cout,cmid,1,1)) + BN folded
    kp = jax.random.fold_in(key, 99)
    w_p = 0.1 * jax.random.normal(kp, (cout, cmid), jnp.float32)
    s_p, b_p = _bn_fold(jax.random.fold_in(key, 100), cout)
    w2 = (w_p * s_p[:, None]).T
    b2 = b_p[None, :]

    return {
        "w1": w1, "b1": b1, "dw": dw, "dwb": dwb,
        "sew1": fc1_w.T, "seb1": fc1_b[None, :],
        "sew2": fc2_w.T, "seb2": fc2_b[None, :],
        "w2": w2, "b2": b2,
        "add": (cin == cout and stride == 1),
        "ksize": ksize, "cin": cin, "cout": cout, "cmid": cmid, "cse": cse,
    }


def init_mb_block(key, cin, cout, ksize=3, stride=1, expand_ratio=6, reps=1):
    keys = jax.random.split(key, reps)
    blocks = [init_mbconv(keys[0], cin, cout, ksize, stride, expand_ratio)]
    for i in range(reps - 1):
        blocks.append(init_mbconv(keys[i + 1], cout, cout, ksize, 1,
                                  expand_ratio))
    return blocks


def _prep_block(blocks, mxu_dt, act_dt):
    """Stack per-rep weights with a leading reps axis, lane-pad channels."""
    ksize = blocks[0]["ksize"]
    c_io = _rup(max(max(b["cin"], b["cout"]) for b in blocks))
    c_mid = _rup(max(b["cmid"] for b in blocks))
    c_se = _rup(max(b["cse"] for b in blocks))

    def stk(name, shape, dtype):
        return jnp.stack([_pad_to(b[name], shape) for b in blocks]).astype(dtype)

    stacked = (
        stk("w1", (c_io, c_mid), mxu_dt),
        stk("b1", (1, c_mid), jnp.float32),
        stk("dw", (ksize * ksize, c_mid), act_dt),
        stk("dwb", (1, c_mid), jnp.float32),
        stk("sew1", (c_mid, c_se), jnp.float32),
        stk("seb1", (1, c_se), jnp.float32),
        stk("sew2", (c_se, c_mid), jnp.float32),
        stk("seb2", (1, c_mid), jnp.float32),
        stk("w2", (c_mid, c_io), mxu_dt),
        stk("b2", (1, c_io), jnp.float32),
    )
    return stacked, c_io


def mb_block_forward(x_nchw, blocks, *, mxu_bf16=True, act_bf16=False):
    """NCHW in / NCHW out, matching the PyTorch module (inference mode).

    mxu_bf16: feed bf16 operands to the 1x1-conv MXU matmuls (f32 accum);
              elementwise math stays f32, safe on all TPU generations.
              Set False for a bit-careful f32 validation path.
    act_bf16: additionally hold/roll the depthwise + carried activation in
              bf16 (recommended on v6e/v7x; keep False on v5e).
    """
    mxu_dt = jnp.bfloat16 if mxu_bf16 else jnp.float32
    act_dt = jnp.bfloat16 if act_bf16 else jnp.float32
    cout = blocks[-1]["cout"]
    ksize = blocks[0]["ksize"]
    adds = jnp.array([1 if b["add"] else 0 for b in blocks], jnp.int32)

    stacked, c_io = _prep_block(blocks, mxu_dt, act_dt)

    N, C, H, W = x_nchw.shape
    x = jnp.transpose(x_nchw, (0, 2, 3, 1))                 # NCHW -> NHWC
    x = jnp.pad(x, ((0, 0), (0, 0), (0, 0), (0, c_io - C)))  # lane-dense
    x = x.reshape(N, H * W, c_io).astype(act_dt)             # flattened (HW, C)

    y = mb_block_call(x, adds, stacked, H=H, W=W, ksize=ksize,
                      mxu_bf16=mxu_bf16, act_bf16=act_bf16)
    y = y.reshape(N, H, W, c_io)[..., :cout].astype(jnp.float32)
    return jnp.transpose(y, (0, 3, 1, 2))                   # NHWC -> NCHW


# ------------------------------ pure-JAX ref --------------------------------


def mbconv_ref(x, prm, ksize, add):
    cmid = prm["cmid"]
    h = jax.nn.silu(jnp.einsum("nhwc,cd->nhwd", x, prm["w1"]) + prm["b1"][0])
    dwk = prm["dw"].reshape(ksize, ksize, 1, cmid)           # HWIO depthwise
    h = lax.conv_general_dilated(
        h, dwk, window_strides=(1, 1), padding="SAME",
        dimension_numbers=("NHWC", "HWIO", "NHWC"),
        feature_group_count=cmid) + prm["dwb"][0]
    h = jax.nn.silu(h)
    s = jnp.mean(h, axis=(1, 2))
    s = jax.nn.silu(s @ prm["sew1"] + prm["seb1"][0])
    s = jax.nn.sigmoid(s @ prm["sew2"] + prm["seb2"][0])
    h = h * s[:, None, None, :]
    out = jnp.einsum("nhwc,cd->nhwd", h, prm["w2"]) + prm["b2"][0]
    if add:
        out = (out + x) * 0.5
    return out


def mb_block_ref(x_nchw, blocks):
    x = jnp.transpose(x_nchw, (0, 2, 3, 1))
    for bp in blocks:
        x = mbconv_ref(x, bp, bp["ksize"], bp["add"])
    return jnp.transpose(x, (0, 3, 1, 2))


# ---------------------------------- main ------------------------------------

if __name__ == "__main__":
    key = jax.random.PRNGKey(0)
    kx, kp = jax.random.split(key)

    N, Cin, H, W = 2, 4, 16, 16
    Cout, ksize, stride, expand, reps = 8, 3, 1, 6, 2

    x = jax.random.normal(kx, (N, Cin, H, W), jnp.float32)      # NCHW input
    blocks = init_mb_block(kp, Cin, Cout, ksize, stride, expand, reps)

    ref = jax.block_until_ready(mb_block_ref(x, blocks))

    # 1) f32 validation path: exact semantics of the PyTorch module.
    out_f32 = jax.block_until_ready(
        mb_block_forward(x, blocks, mxu_bf16=False, act_bf16=False))
    assert out_f32.shape == (N, Cout, H, W), out_f32.shape
    assert jnp.allclose(out_f32, ref, rtol=1e-4, atol=1e-4), \
        float(jnp.max(jnp.abs(out_f32 - ref)))

    # 2) recommended default: bf16 MXU operands, f32 elementwise (all gens).
    out_def = jax.block_until_ready(mb_block_forward(x, blocks))
    assert out_def.shape == (N, Cout, H, W), out_def.shape
    assert bool(jnp.all(jnp.isfinite(out_def)))
    assert float(jnp.max(jnp.abs(out_def - ref))) < 0.15

    # 3) v6e/v7x low-precision mode: bf16 depthwise activations + carry.
    out_bf = jax.block_until_ready(
        mb_block_forward(x, blocks, mxu_bf16=True, act_bf16=True))
    assert out_bf.shape == (N, Cout, H, W), out_bf.shape
    assert bool(jnp.all(jnp.isfinite(out_bf)))
    assert float(jnp.max(jnp.abs(out_bf - ref))) < 0.3

    print("KERNEL_OK")
</pallas_src>

<mosaic_0001>
module attributes {stable_mosaic.version = 11 : i64} {
  func.func @probe(%arg0: memref<8x128xf32, #tpu.memory_space<vmem>>, %arg1: memref<8x128xf32, #tpu.memory_space<vmem>>) attributes {dimension_semantics = [], scalar_prefetch = 0 : i64, scratch_operands = 0 : i64, tpu.core_type = #tpu.core_type<tc>} {
    %c0 = arith.constant 0 : index
    %c0_0 = arith.constant 0 : index
    %0 = vector.load %arg0[%c0, %c0_0] : memref<8x128xf32, #tpu.memory_space<vmem>>, vector<8x128xf32>
    %c1_i32 = arith.constant 1 : i32
    %1 = tpu.dynamic_rotate %0 by %c1_i32 dim 0 : vector<8x128xf32>, i32 -> vector<8x128xf32>
    %c0_1 = arith.constant 0 : index
    %c0_2 = arith.constant 0 : index
    %2 = vector.load %arg1[%c0_1, %c0_2] : memref<8x128xf32, #tpu.memory_space<vmem>>, vector<8x128xf32>
    tpu.vector_store %arg1[%c0_1, %c0_2], %1 {strides = array<i32>} : memref<8x128xf32, #tpu.memory_space<vmem>>, vector<8x128xf32>,
    return
  }
}

</mosaic_0001>

<bundles_post_ra>
// kernel: tpu_custom_call.1
= control target key start
LH: loop header
LB: loop body
LE: loop exit
PB: predicated region body
PF: predicated region fallthrough
CT: control target
= control target key end

     0   :  { %6 = vsyncpa [#allocation3], 0  ;;  %s125_s0 = inlined_call_operand.hbm [shape: f32[8,128], index: 0, kind: input, shape index: {}]   ;;  %s126_s1 = inlined_call_operand.hbm [shape: f32[8,128], index: 1, kind: output, shape index: {}]  }
   0x1   :  { %7 = vsyncpa [#allocation4], 0  ;;  %s89_s6 = smov [#allocation2]   ;;  %s41_s10 = scalar_lea.hbm %s125_s0, 128 }
   0x2   :  { %s14_s7 = sshll.u32 %s89_s6, 4  ;;  %p42_p0 = scmp.ne.s32.totalorder %s125_s0, %s41_s10  ;;  %s15_s7 = int_to_ptr.vmem [resolvable:$true] %s14_s7 }
   0x3   :  { %p45_p1 = scmp.lt.u32.totalorder %s41_s10, %s125_s0 }
   0x5   :  { %p47_p2 = pnand %p45_p1, %p42_p0 }
   0x7   :  { %50 = shalt.err (!%p47_p2)
}
   0x8   :  { %s51_s15 = scalar_lea.vmem %s15_s7, 128  ;;  %p56_p4 = scmp.lt.s32.totalorder %s15_s7, %s15_s7 }
   0x9   :  { %p52_p3 = scmp.ne.s32.totalorder %s15_s7, %s51_s15  ;;  %p57_p5 = scmp.lt.s32.totalorder %s51_s15, %s51_s15 }
   0xb   :  { %p58_p6 = por %p57_p5, %p56_p4 }
   0xd   :  { %p59_p7 = pnand %p58_p6, %p52_p3 }
   0xf   :  { %62 = shalt.err (!%p59_p7)
}
  0x10   :  { %17 = dma.hbm_to_vmem [thread:$0]  %s125_s0, 128, %s15_s7, [#allocation3]  }
  0x11   :  { %85 = dma.done.wait [#allocation3], 128  }
  0x12   :  { %86 = vsyncadd [#allocation3], 4294967168  ;;  %s90_s18 = smov [#allocation5]   ;;  %v21_v0 = vld [vmem:[#allocation2] sm:$0xff] }
  0x13   :  { %s30_s19 = sshll.u32 %s90_s18, 4  ;;  %v22_v1 = vrot.slane %v21_v0, 7  ;;  %s31_s19 = int_to_ptr.vmem [resolvable:$true] %s30_s19 }
  0x14   :  { %s63_s20 = scalar_lea.vmem %s31_s19, 128  ;;  %p68_p9 = scmp.lt.s32.totalorder %s31_s19, %s31_s19 }
  0x15   :  { %23 = vst [vmem:[#allocation5] sm:$0xff] %v22_v1  ;;  %p64_p8 = scmp.ne.s32.totalorder %s31_s19, %s63_s20  ;;  %p69_p10 = scmp.lt.s32.totalorder %s63_s20, %s63_s20 }
  0x17   :  { %p70_p11 = por %p69_p10, %p68_p9 }
  0x19   :  { %p71_p12 = pnand %p70_p11, %p64_p8 }
  0x1b   :  { %74 = shalt.err (!%p71_p12)
}
  0x1c   :  { %s75_s23 = scalar_lea.hbm %s126_s1, 128 }
  0x1d   :  { %p76_p13 = scmp.ne.s32.totalorder %s126_s1, %s75_s23  ;;  %p79_p0 = scmp.lt.u32.totalorder %s75_s23, %s126_s1 }
  0x1f   :  { %p81_p1 = pnand %p79_p0, %p76_p13 }
  0x21   :  { %84 = shalt.err (!%p81_p1)
}
  0x22   :  { %33 = dma.vmem_to_hbm [thread:$0]  %s31_s19, 128, %s126_s1, [#allocation4]  }
  0x23   :  { %87 = dma.done.wait [#allocation4], 128  }
  0x24   :  { %88 = vsyncadd [#allocation4], 4294967168 }
  0x25   :  { %37 = vsyncpa [#allocation3], 1 }
  0x26   :  { %38 = vsyncpa [#allocation4], 1 }

</bundles_post_ra>
